<compile_context>
chip_gen: v5e
topology: v5e:2x2
jax: 0.10.0
libtpu: 0.0.40
codegen_flags: <defaults>
</compile_context>

<pallas_src>
import functools

import jax
import jax.numpy as jnp
from jax.experimental import pallas as pl
from jax.experimental.pallas import tpu as pltpu


def rnn_chunk_kernel(x_ref, h0_ref, wx_ref, wh_ref, b_ref,
                     out_ref, hT_ref, h_sc, xp_sc, *,
                     hidden_size, output_size, chunk, batch, compute_dtype):
    """One time-chunk per grid iteration.

    Per-chunk shapes (Bp = padded batch, HOp = padded fused width):
      x_ref  : [chunk*Bp, I]   inputs for this chunk, flattened over (t, b)
      h0_ref : [Bp, H]         initial hidden
      wx_ref : [I, HOp]        input rows of [W_i2h | W_i2o] (zero-padded cols)
      wh_ref : [H, HOp]        hidden rows of [W_i2h | W_i2o]
      b_ref  : [1, HOp]        [b_i2h | b_i2o] (f32)
      out_ref: [chunk, Bp, HOp] per-step fused log-softmax rows
      hT_ref : [Bp, H]         final hidden (written on last chunk)
      h_sc   : [Bp, H]         hidden carried across chunks
      xp_sc  : [chunk*Bp, HOp] chunk input projection (f32)
    """
    c = pl.program_id(0)

    @pl.when(c == 0)
    def _init():
        h_sc[...] = h0_ref[...]

    # Chunk prologue: ONE large MXU pass for the whole chunk's input
    # projection + bias (hoisted out of the recurrence).
    xp_sc[...] = (
        jnp.dot(x_ref[...], wx_ref[...], preferred_element_type=jnp.float32)
        + b_ref[...])

    # Hoisted loop invariants: logit-column mask and recurrent weights.
    hop = b_ref.shape[1]
    col = jax.lax.broadcasted_iota(jnp.int32, (batch, hop), 1)
    is_logit = (col >= hidden_size) & (col < hidden_size + output_size)
    neg_big = jnp.float32(-1e30)
    wh = wh_ref[...]

    def step(t, h):
        base = pl.multiple_of(t * batch, batch)
        xp = xp_sc[pl.ds(base, batch), :]                       # [Bp, HOp]
        fused = xp + jnp.dot(h.astype(compute_dtype), wh,
                             preferred_element_type=jnp.float32)
        # Masked, numerically-stable log-softmax over the logit columns.
        m = jnp.max(jnp.where(is_logit, fused, neg_big), axis=1, keepdims=True)
        shifted = fused - m
        sumexp = jnp.sum(jnp.exp(jnp.where(is_logit, shifted, neg_big)),
                         axis=1, keepdims=True)
        out_ref[t] = shifted - jnp.log(sumexp)    # valid only on logit cols
        return fused[:, :hidden_size]             # new hidden (no tanh, as in ref)

    h_fin = jax.lax.fori_loop(0, chunk, step, h_sc[...], unroll=True)
    h_sc[...] = h_fin

    @pl.when(c == pl.num_programs(0) - 1)
    def _finalize():
        hT_ref[...] = h_fin


def make_fused_params(w_i2h, b_i2h, w_i2o, b_i2o, input_size,
                      compute_dtype=jnp.bfloat16):
    """Fuse i2h / i2o params into the kernel layout, padding N to 128*k.

    w_i2h: [input+hidden, hidden]  (transposed vs torch's [out, in])
    w_i2o: [input+hidden, output]
    """
    H = w_i2h.shape[1]
    O = w_i2o.shape[1]
    HO = H + O
    HOp = ((HO + 127) // 128) * 128
    pad = HOp - HO
    wx = jnp.pad(jnp.concatenate([w_i2h[:input_size], w_i2o[:input_size]], 1),
                 ((0, 0), (0, pad)))
    wh = jnp.pad(jnp.concatenate([w_i2h[input_size:], w_i2o[input_size:]], 1),
                 ((0, 0), (0, pad)))
    b = jnp.pad(jnp.concatenate([b_i2h, b_i2o]), (0, pad)).reshape(1, HOp)
    return {"wx": wx.astype(compute_dtype), "wh": wh.astype(compute_dtype),
            "b": b.astype(jnp.float32), "H": H, "O": O}


def rnn_forward(x_seq, h0, params, *, chunk=None):
    """Full-sequence RNN. x_seq: [T, B, I], h0: [B, H].

    Returns (log_probs [T, B, O], h_final [B, H]).
    """
    T, B, I = x_seq.shape
    H, O = params["H"], params["O"]
    wx, wh, b = params["wx"], params["wh"], params["b"]
    HOp = wx.shape[1]
    compute_dtype = wx.dtype
    Bp = ((B + 7) // 8) * 8                      # sublane-pad batch
    if chunk is None:
        chunk = T
    assert T % chunk == 0, "T must be divisible by the time chunk"
    num_chunks = T // chunk

    # Host-side padding / flattening (lane- and sublane-dense kernel shapes).
    x_p = jnp.pad(x_seq.astype(compute_dtype), ((0, 0), (0, Bp - B), (0, 0)))
    x2d = x_p.reshape(T * Bp, I)
    h0_p = jnp.pad(h0.astype(jnp.float32), ((0, Bp - B), (0, 0)))

    kernel = functools.partial(
        rnn_chunk_kernel, hidden_size=H, output_size=O, chunk=chunk,
        batch=Bp, compute_dtype=compute_dtype)

    itemsize = jnp.dtype(compute_dtype).itemsize
    cost = pl.CostEstimate(
        flops=2 * T * Bp * (I + H) * HOp,
        transcendentals=T * Bp * HOp,
        bytes_accessed=(T * Bp * I * itemsize          # x stream
                        + T * Bp * HOp * 4             # per-step outputs
                        + (I + H) * HOp * itemsize     # weights
                        + 2 * Bp * H * 4))             # h0 / hT

    out_full, hT = pl.pallas_call(
        kernel,
        grid=(num_chunks,),
        in_specs=[
            pl.BlockSpec((chunk * Bp, I), lambda c: (c, 0)),   # x: one chunk/iter
            pl.BlockSpec((Bp, H), lambda c: (0, 0)),           # h0: resident
            pl.BlockSpec((I, HOp), lambda c: (0, 0)),          # Wx: resident
            pl.BlockSpec((H, HOp), lambda c: (0, 0)),          # Wh: resident
            pl.BlockSpec((1, HOp), lambda c: (0, 0)),          # bias: resident
        ],
        out_specs=(
            pl.BlockSpec((chunk, Bp, HOp), lambda c: (c, 0, 0)),
            pl.BlockSpec((Bp, H), lambda c: (0, 0)),
        ),
        out_shape=(
            jax.ShapeDtypeStruct((T, Bp, HOp), jnp.float32),
            jax.ShapeDtypeStruct((Bp, H), jnp.float32),
        ),
        scratch_shapes=[
            pltpu.VMEM((Bp, H), jnp.float32),            # carried hidden
            pltpu.VMEM((chunk * Bp, HOp), jnp.float32),  # chunk x-projection
        ],
        input_output_aliases={1: 1},                     # h0 buffer -> h_final
        compiler_params=pltpu.CompilerParams(
            dimension_semantics=("arbitrary",),          # sequential recurrence
        ),
        cost_estimate=cost,
    )(x2d, h0_p, wx, wh, b)

    # TODO(synk): for batch >> 8 on v7x, add a leading "parallel" batch grid
    # axis so both TensorCores are used; time must stay "arbitrary".
    return out_full[:, :B, H:H + O], hT[:B, :]


def rnn_step(x, h, params):
    """Single step matching the module's forward(input, hidden)."""
    out, new_h = rnn_forward(x[None], h, params)
    return out[0], new_h


def init_params(key, input_size, hidden_size, output_size):
    """PyTorch-style uniform(-1/sqrt(fan_in), 1/sqrt(fan_in)) init (raw layout)."""
    fan_in = input_size + hidden_size
    bound = 1.0 / float(fan_in) ** 0.5
    k = jax.random.split(key, 4)
    w_i2h = jax.random.uniform(k[0], (fan_in, hidden_size), jnp.float32, -bound, bound)
    b_i2h = jax.random.uniform(k[1], (hidden_size,), jnp.float32, -bound, bound)
    w_i2o = jax.random.uniform(k[2], (fan_in, output_size), jnp.float32, -bound, bound)
    b_i2o = jax.random.uniform(k[3], (output_size,), jnp.float32, -bound, bound)
    return w_i2h, b_i2h, w_i2o, b_i2o


def rnn_forward_ref(x_seq, h0, raw_params):
    """Pure-JAX reference (mirrors the PyTorch forward, scanned over time)."""
    w_i2h, b_i2h, w_i2o, b_i2o = raw_params

    def step(h, x):
        combined = jnp.concatenate([x, h], axis=1)
        new_h = combined @ w_i2h + b_i2h
        out = jax.nn.log_softmax(combined @ w_i2o + b_i2o, axis=1)
        return new_h, out

    h_final, outs = jax.lax.scan(step, h0, x_seq)
    return outs, h_final


if __name__ == "__main__":
    input_size, hidden_size, output_size = 16, 32, 8
    batch, seq_len = 2, 8

    key = jax.random.PRNGKey(0)
    kx, kp = jax.random.split(key)
    x_seq = jax.random.normal(kx, (seq_len, batch, input_size), jnp.float32)
    h0 = jnp.zeros((batch, hidden_size), jnp.float32)   # initHidden-style state

    raw = init_params(kp, input_size, hidden_size, output_size)
    outs_ref, h_final_ref = rnn_forward_ref(x_seq, h0, raw)

    # --- f32 operands: exact parity with the f32 PyTorch module -------------
    fused_f32 = make_fused_params(*raw, input_size=input_size,
                                  compute_dtype=jnp.float32)
    outs, h_final = jax.block_until_ready(rnn_forward(x_seq, h0, fused_f32))
    assert outs.shape == (seq_len, batch, output_size)
    assert h_final.shape == (batch, hidden_size)
    assert jnp.allclose(outs, outs_ref, atol=1e-4), "sequence output mismatch"
    assert jnp.allclose(h_final, h_final_ref, atol=1e-4), "final hidden mismatch"

    # --- bf16 MXU operands (default fast path), f32 accumulation ------------
    fused_bf16 = make_fused_params(*raw, input_size=input_size)
    outs_bf, h_bf = jax.block_until_ready(rnn_forward(x_seq, h0, fused_bf16))
    assert jnp.allclose(outs_bf, outs_ref, atol=5e-2), "bf16 output mismatch"
    assert jnp.allclose(h_bf, h_final_ref, atol=5e-2), "bf16 hidden mismatch"

    # --- chunked time grid (grid > 1) exercises the cross-chunk carry -------
    outs_c, h_c = jax.block_until_ready(rnn_forward(x_seq, h0, fused_f32, chunk=4))
    assert jnp.allclose(outs_c, outs_ref, atol=1e-4), "chunked output mismatch"
    assert jnp.allclose(h_c, h_final_ref, atol=1e-4), "chunked hidden mismatch"

    # --- single-step API matching the module's forward(input, hidden) -------
    out1, h1 = jax.block_until_ready(rnn_step(x_seq[0], h0, fused_f32))
    out1_ref, h1_ref = rnn_forward_ref(x_seq[:1], h0, raw)
    assert jnp.allclose(out1, out1_ref[0], atol=1e-4), "step output mismatch"
    assert jnp.allclose(h1, h1_ref, atol=1e-4), "step hidden mismatch"

    print("KERNEL_OK")
</pallas_src>

<mosaic_0001>
module attributes {stable_mosaic.version = 11 : i64} {
  func.func @rnn_chunk_kernel(%arg0: i32, %arg1: memref<64x16xf32, #tpu.memory_space<vmem>>, %arg2: memref<8x32xf32, #tpu.memory_space<vmem>>, %arg3: memref<16x128xf32, #tpu.memory_space<vmem>>, %arg4: memref<32x128xf32, #tpu.memory_space<vmem>>, %arg5: memref<1x128xf32, #tpu.memory_space<vmem>>, %arg6: memref<8x8x128xf32, #tpu.memory_space<vmem>>, %arg7: memref<8x32xf32, #tpu.memory_space<vmem>>, %arg8: memref<8x32xf32, #tpu.memory_space<vmem>>, %arg9: memref<64x128xf32, #tpu.memory_space<vmem>>) attributes {dimension_semantics = [#tpu.dimension_semantics<arbitrary>], iteration_bounds = array<i64: 1>, scalar_prefetch = 0 : i64, scratch_operands = 2 : i64, tpu.core_type = #tpu.core_type<tc>, window_params = [{transform_indices = @transform_0, window_bounds = array<i64: 64, 16>}, {pipeline_mode = #tpu.pipeline_mode<synchronous>, transform_indices = @transform_1, window_bounds = array<i64: 8, 32>}, {pipeline_mode = #tpu.pipeline_mode<synchronous>, transform_indices = @transform_2, window_bounds = array<i64: 16, 128>}, {pipeline_mode = #tpu.pipeline_mode<synchronous>, transform_indices = @transform_3, window_bounds = array<i64: 32, 128>}, {pipeline_mode = #tpu.pipeline_mode<synchronous>, transform_indices = @transform_4, window_bounds = array<i64: 1, 128>}, {transform_indices = @transform_5, window_bounds = array<i64: 8, 8, 128>}, {pipeline_mode = #tpu.pipeline_mode<synchronous>, transform_indices = @transform_6, window_bounds = array<i64: 8, 32>}]} {
    %c0_i32 = arith.constant 0 : i32
    %0 = arith.cmpi eq, %arg0, %c0_i32 : i32
    %1 = arith.extui %0 : i1 to i32
    %c0_i32_0 = arith.constant 0 : i32
    %2 = arith.cmpi ne, %1, %c0_i32_0 : i32
    scf.if %2 {
      %c0_74 = arith.constant 0 : index
      %c0_75 = arith.constant 0 : index
      %222 = vector.load %arg2[%c0_74, %c0_75] : memref<8x32xf32, #tpu.memory_space<vmem>>, vector<8x32xf32>
      %c0_76 = arith.constant 0 : index
      %c0_77 = arith.constant 0 : index
      %223 = vector.load %arg8[%c0_76, %c0_77] : memref<8x32xf32, #tpu.memory_space<vmem>>, vector<8x32xf32>
      tpu.vector_store %arg8[%c0_76, %c0_77], %222 {strides = array<i32>} : memref<8x32xf32, #tpu.memory_space<vmem>>, vector<8x32xf32>,
    } else {
    }
    %c0 = arith.constant 0 : index
    %c0_1 = arith.constant 0 : index
    %3 = vector.load %arg1[%c0, %c0_1] : memref<64x16xf32, #tpu.memory_space<vmem>>, vector<64x16xf32>
    %c0_2 = arith.constant 0 : index
    %c0_3 = arith.constant 0 : index
    %4 = vector.load %arg3[%c0_2, %c0_3] : memref<16x128xf32, #tpu.memory_space<vmem>>, vector<16x128xf32>
    %cst = arith.constant dense<0.000000e+00> : vector<64x128xf32>
    %5 = tpu.matmul %3, %4, %cst {dimension_numbers = #tpu.dot_dimension_numbers<[1], [0], [0], [1], [0, 0, 1, 1], [], []>} : vector<64x16xf32>, vector<16x128xf32>, vector<64x128xf32> -> vector<64x128xf32>
    %c0_4 = arith.constant 0 : index
    %c0_5 = arith.constant 0 : index
    %6 = vector.load %arg5[%c0_4, %c0_5] : memref<1x128xf32, #tpu.memory_space<vmem>>, vector<1x128xf32>
    %7 = vector.broadcast %6 : vector<1x128xf32> to vector<64x128xf32>
    %8 = arith.addf %5, %7 : vector<64x128xf32>
    %c0_6 = arith.constant 0 : index
    %c0_7 = arith.constant 0 : index
    %9 = vector.load %arg9[%c0_6, %c0_7] : memref<64x128xf32, #tpu.memory_space<vmem>>, vector<64x128xf32>
    tpu.vector_store %arg9[%c0_6, %c0_7], %8 {strides = array<i32>} : memref<64x128xf32, #tpu.memory_space<vmem>>, vector<64x128xf32>,
    %10 = tpu.iota {dimensions = array<i32: 1>} : vector<8x128xi32>
    %c32_i32 = arith.constant 32 : i32
    %11 = vector.broadcast %c32_i32 : i32 to vector<8x128xi32>
    %12 = arith.cmpi sge, %10, %11 : vector<8x128xi32>
    %c40_i32 = arith.constant 40 : i32
    %13 = vector.broadcast %c40_i32 : i32 to vector<8x128xi32>
    %14 = arith.cmpi slt, %10, %13 : vector<8x128xi32>
    %15 = arith.andi %12, %14 : vector<8x128xi1>
    %c0_8 = arith.constant 0 : index
    %c0_9 = arith.constant 0 : index
    %16 = vector.load %arg4[%c0_8, %c0_9] : memref<32x128xf32, #tpu.memory_space<vmem>>, vector<32x128xf32>
    %c0_10 = arith.constant 0 : index
    %c0_11 = arith.constant 0 : index
    %17 = vector.load %arg8[%c0_10, %c0_11] : memref<8x32xf32, #tpu.memory_space<vmem>>, vector<8x32xf32>
    %cst_12 = arith.constant -1.000000e+30 : f32
    %c0_i32_13 = arith.constant 0 : i32
    %c8_i32 = arith.constant 8 : i32
    %18 = arith.muli %c0_i32_13, %c8_i32 : i32
    %19 = tpu.assume_multiple %18, 8 : i32
    %20 = arith.index_cast %19 : i32 to index
    %c0_14 = arith.constant 0 : index
    %21 = vector.load %arg9[%20, %c0_14] : memref<64x128xf32, #tpu.memory_space<vmem>>, vector<8x128xf32>
    %cst_15 = arith.constant dense<0.000000e+00> : vector<8x128xf32>
    %22 = tpu.matmul %17, %16, %cst_15 {dimension_numbers = #tpu.dot_dimension_numbers<[1], [0], [0], [1], [0, 0, 1, 1], [], []>} : vector<8x32xf32>, vector<32x128xf32>, vector<8x128xf32> -> vector<8x128xf32>
    %23 = arith.addf %21, %22 : vector<8x128xf32>
    %24 = vector.broadcast %cst_12 : f32 to vector<8x128xf32>
    %25 = arith.select %15, %23, %24 : vector<8x128xi1>, vector<8x128xf32>
    %cst_16 = arith.constant dense<0xFF800000> : vector<8xf32>
    %26 = vector.multi_reduction <maximumf>, %25, %cst_16 [1] : vector<8x128xf32> to vector<8xf32>
    %27 = vector.shape_cast %26 : vector<8xf32> to vector<8x1xf32>
    %28 = vector.broadcast %27 : vector<8x1xf32> to vector<8x128xf32>
    %29 = arith.subf %23, %28 : vector<8x128xf32>
    %30 = vector.broadcast %cst_12 : f32 to vector<8x128xf32>
    %31 = arith.select %15, %29, %30 : vector<8x128xi1>, vector<8x128xf32>
    %32 = math.exp %31 : vector<8x128xf32>
    %cst_17 = arith.constant dense<0.000000e+00> : vector<8xf32>
    %33 = vector.multi_reduction <add>, %32, %cst_17 [1] : vector<8x128xf32> to vector<8xf32>
    %34 = vector.shape_cast %33 : vector<8xf32> to vector<8x1xf32>
    %35 = math.log %34 : vector<8x1xf32>
    %36 = vector.broadcast %35 : vector<8x1xf32> to vector<8x128xf32>
    %37 = arith.subf %29, %36 : vector<8x128xf32>
    %38 = arith.index_cast %c0_i32_13 : i32 to index
    %c0_18 = arith.constant 0 : index
    %c0_19 = arith.constant 0 : index
    %39 = vector.load %arg6[%38, %c0_18, %c0_19] : memref<8x8x128xf32, #tpu.memory_space<vmem>>, vector<1x8x128xf32>
    %40 = vector.shape_cast %39 : vector<1x8x128xf32> to vector<8x128xf32>
    %41 = vector.shape_cast %37 : vector<8x128xf32> to vector<1x8x128xf32>
    tpu.vector_store %arg6[%38, %c0_18, %c0_19], %41 {strides = array<i32>} : memref<8x8x128xf32, #tpu.memory_space<vmem>>, vector<1x8x128xf32>,
    %42 = vector.extract_strided_slice %23 {offsets = [0, 0], sizes = [8, 32], strides = [1, 1]} : vector<8x128xf32> to vector<8x32xf32>
    %c1_i32 = arith.constant 1 : i32
    %c8_i32_20 = arith.constant 8 : i32
    %43 = arith.muli %c1_i32, %c8_i32_20 : i32
    %44 = tpu.assume_multiple %43, 8 : i32
    %45 = arith.index_cast %44 : i32 to index
    %c0_21 = arith.constant 0 : index
    %46 = vector.load %arg9[%45, %c0_21] : memref<64x128xf32, #tpu.memory_space<vmem>>, vector<8x128xf32>
    %cst_22 = arith.constant dense<0.000000e+00> : vector<8x128xf32>
    %47 = tpu.matmul %42, %16, %cst_22 {dimension_numbers = #tpu.dot_dimension_numbers<[1], [0], [0], [1], [0, 0, 1, 1], [], []>} : vector<8x32xf32>, vector<32x128xf32>, vector<8x128xf32> -> vector<8x128xf32>
    %48 = arith.addf %46, %47 : vector<8x128xf32>
    %49 = vector.broadcast %cst_12 : f32 to vector<8x128xf32>
    %50 = arith.select %15, %48, %49 : vector<8x128xi1>, vector<8x128xf32>
    %cst_23 = arith.constant dense<0xFF800000> : vector<8xf32>
    %51 = vector.multi_reduction <maximumf>, %50, %cst_23 [1] : vector<8x128xf32> to vector<8xf32>
    %52 = vector.shape_cast %51 : vector<8xf32> to vector<8x1xf32>
    %53 = vector.broadcast %52 : vector<8x1xf32> to vector<8x128xf32>
    %54 = arith.subf %48, %53 : vector<8x128xf32>
    %55 = vector.broadcast %cst_12 : f32 to vector<8x128xf32>
    %56 = arith.select %15, %54, %55 : vector<8x128xi1>, vector<8x128xf32>
    %57 = math.exp %56 : vector<8x128xf32>
    %cst_24 = arith.constant dense<0.000000e+00> : vector<8xf32>
    %58 = vector.multi_reduction <add>, %57, %cst_24 [1] : vector<8x128xf32> to vector<8xf32>
    %59 = vector.shape_cast %58 : vector<8xf32> to vector<8x1xf32>
    %60 = math.log %59 : vector<8x1xf32>
    %61 = vector.broadcast %60 : vector<8x1xf32> to vector<8x128xf32>
    %62 = arith.subf %54, %61 : vector<8x128xf32>
    %63 = arith.index_cast %c1_i32 : i32 to index
    %c0_25 = arith.constant 0 : index
    %c0_26 = arith.constant 0 : index
    %64 = vector.load %arg6[%63, %c0_25, %c0_26] : memref<8x8x128xf32, #tpu.memory_space<vmem>>, vector<1x8x128xf32>
    %65 = vector.shape_cast %64 : vector<1x8x128xf32> to vector<8x128xf32>
    %66 = vector.shape_cast %62 : vector<8x128xf32> to vector<1x8x128xf32>
    tpu.vector_store %arg6[%63, %c0_25, %c0_26], %66 {strides = array<i32>} : memref<8x8x128xf32, #tpu.memory_space<vmem>>, vector<1x8x128xf32>,
    %67 = vector.extract_strided_slice %48 {offsets = [0, 0], sizes = [8, 32], strides = [1, 1]} : vector<8x128xf32> to vector<8x32xf32>
    %c2_i32 = arith.constant 2 : i32
    %c8_i32_27 = arith.constant 8 : i32
    %68 = arith.muli %c2_i32, %c8_i32_27 : i32
    %69 = tpu.assume_multiple %68, 8 : i32
    %70 = arith.index_cast %69 : i32 to index
    %c0_28 = arith.constant 0 : index
    %71 = vector.load %arg9[%70, %c0_28] : memref<64x128xf32, #tpu.memory_space<vmem>>, vector<8x128xf32>
    %cst_29 = arith.constant dense<0.000000e+00> : vector<8x128xf32>
    %72 = tpu.matmul %67, %16, %cst_29 {dimension_numbers = #tpu.dot_dimension_numbers<[1], [0], [0], [1], [0, 0, 1, 1], [], []>} : vector<8x32xf32>, vector<32x128xf32>, vector<8x128xf32> -> vector<8x128xf32>
    %73 = arith.addf %71, %72 : vector<8x128xf32>
    %74 = vector.broadcast %cst_12 : f32 to vector<8x128xf32>
    %75 = arith.select %15, %73, %74 : vector<8x128xi1>, vector<8x128xf32>
    %cst_30 = arith.constant dense<0xFF800000> : vector<8xf32>
    %76 = vector.multi_reduction <maximumf>, %75, %cst_30 [1] : vector<8x128xf32> to vector<8xf32>
    %77 = vector.shape_cast %76 : vector<8xf32> to vector<8x1xf32>
    %78 = vector.broadcast %77 : vector<8x1xf32> to vector<8x128xf32>
    %79 = arith.subf %73, %78 : vector<8x128xf32>
    %80 = vector.broadcast %cst_12 : f32 to vector<8x128xf32>
    %81 = arith.select %15, %79, %80 : vector<8x128xi1>, vector<8x128xf32>
    %82 = math.exp %81 : vector<8x128xf32>
    %cst_31 = arith.constant dense<0.000000e+00> : vector<8xf32>
    %83 = vector.multi_reduction <add>, %82, %cst_31 [1] : vector<8x128xf32> to vector<8xf32>
    %84 = vector.shape_cast %83 : vector<8xf32> to vector<8x1xf32>
    %85 = math.log %84 : vector<8x1xf32>
    %86 = vector.broadcast %85 : vector<8x1xf32> to vector<8x128xf32>
    %87 = arith.subf %79, %86 : vector<8x128xf32>
    %88 = arith.index_cast %c2_i32 : i32 to index
    %c0_32 = arith.constant 0 : index
    %c0_33 = arith.constant 0 : index
    %89 = vector.load %arg6[%88, %c0_32, %c0_33] : memref<8x8x128xf32, #tpu.memory_space<vmem>>, vector<1x8x128xf32>
    %90 = vector.shape_cast %89 : vector<1x8x128xf32> to vector<8x128xf32>
    %91 = vector.shape_cast %87 : vector<8x128xf32> to vector<1x8x128xf32>
    tpu.vector_store %arg6[%88, %c0_32, %c0_33], %91 {strides = array<i32>} : memref<8x8x128xf32, #tpu.memory_space<vmem>>, vector<1x8x128xf32>,
    %92 = vector.extract_strided_slice %73 {offsets = [0, 0], sizes = [8, 32], strides = [1, 1]} : vector<8x128xf32> to vector<8x32xf32>
    %c3_i32 = arith.constant 3 : i32
    %c8_i32_34 = arith.constant 8 : i32
    %93 = arith.muli %c3_i32, %c8_i32_34 : i32
    %94 = tpu.assume_multiple %93, 8 : i32
    %95 = arith.index_cast %94 : i32 to index
    %c0_35 = arith.constant 0 : index
    %96 = vector.load %arg9[%95, %c0_35] : memref<64x128xf32, #tpu.memory_space<vmem>>, vector<8x128xf32>
    %cst_36 = arith.constant dense<0.000000e+00> : vector<8x128xf32>
    %97 = tpu.matmul %92, %16, %cst_36 {dimension_numbers = #tpu.dot_dimension_numbers<[1], [0], [0], [1], [0, 0, 1, 1], [], []>} : vector<8x32xf32>, vector<32x128xf32>, vector<8x128xf32> -> vector<8x128xf32>
    %98 = arith.addf %96, %97 : vector<8x128xf32>
    %99 = vector.broadcast %cst_12 : f32 to vector<8x128xf32>
    %100 = arith.select %15, %98, %99 : vector<8x128xi1>, vector<8x128xf32>
    %cst_37 = arith.constant dense<0xFF800000> : vector<8xf32>
    %101 = vector.multi_reduction <maximumf>, %100, %cst_37 [1] : vector<8x128xf32> to vector<8xf32>
    %102 = vector.shape_cast %101 : vector<8xf32> to vector<8x1xf32>
    %103 = vector.broadcast %102 : vector<8x1xf32> to vector<8x128xf32>
    %104 = arith.subf %98, %103 : vector<8x128xf32>
    %105 = vector.broadcast %cst_12 : f32 to vector<8x128xf32>
    %106 = arith.select %15, %104, %105 : vector<8x128xi1>, vector<8x128xf32>
    %107 = math.exp %106 : vector<8x128xf32>
    %cst_38 = arith.constant dense<0.000000e+00> : vector<8xf32>
    %108 = vector.multi_reduction <add>, %107, %cst_38 [1] : vector<8x128xf32> to vector<8xf32>
    %109 = vector.shape_cast %108 : vector<8xf32> to vector<8x1xf32>
    %110 = math.log %109 : vector<8x1xf32>
    %111 = vector.broadcast %110 : vector<8x1xf32> to vector<8x128xf32>
    %112 = arith.subf %104, %111 : vector<8x128xf32>
    %113 = arith.index_cast %c3_i32 : i32 to index
    %c0_39 = arith.constant 0 : index
    %c0_40 = arith.constant 0 : index
    %114 = vector.load %arg6[%113, %c0_39, %c0_40] : memref<8x8x128xf32, #tpu.memory_space<vmem>>, vector<1x8x128xf32>
    %115 = vector.shape_cast %114 : vector<1x8x128xf32> to vector<8x128xf32>
    %116 = vector.shape_cast %112 : vector<8x128xf32> to vector<1x8x128xf32>
    tpu.vector_store %arg6[%113, %c0_39, %c0_40], %116 {strides = array<i32>} : memref<8x8x128xf32, #tpu.memory_space<vmem>>, vector<1x8x128xf32>,
    %117 = vector.extract_strided_slice %98 {offsets = [0, 0], sizes = [8, 32], strides = [1, 1]} : vector<8x128xf32> to vector<8x32xf32>
    %c4_i32 = arith.constant 4 : i32
    %c8_i32_41 = arith.constant 8 : i32
    %118 = arith.muli %c4_i32, %c8_i32_41 : i32
    %119 = tpu.assume_multiple %118, 8 : i32
    %120 = arith.index_cast %119 : i32 to index
    %c0_42 = arith.constant 0 : index
    %121 = vector.load %arg9[%120, %c0_42] : memref<64x128xf32, #tpu.memory_space<vmem>>, vector<8x128xf32>
    %cst_43 = arith.constant dense<0.000000e+00> : vector<8x128xf32>
    %122 = tpu.matmul %117, %16, %cst_43 {dimension_numbers = #tpu.dot_dimension_numbers<[1], [0], [0], [1], [0, 0, 1, 1], [], []>} : vector<8x32xf32>, vector<32x128xf32>, vector<8x128xf32> -> vector<8x128xf32>
    %123 = arith.addf %121, %122 : vector<8x128xf32>
    %124 = vector.broadcast %cst_12 : f32 to vector<8x128xf32>
    %125 = arith.select %15, %123, %124 : vector<8x128xi1>, vector<8x128xf32>
    %cst_44 = arith.constant dense<0xFF800000> : vector<8xf32>
    %126 = vector.multi_reduction <maximumf>, %125, %cst_44 [1] : vector<8x128xf32> to vector<8xf32>
    %127 = vector.shape_cast %126 : vector<8xf32> to vector<8x1xf32>
    %128 = vector.broadcast %127 : vector<8x1xf32> to vector<8x128xf32>
    %129 = arith.subf %123, %128 : vector<8x128xf32>
    %130 = vector.broadcast %cst_12 : f32 to vector<8x128xf32>
    %131 = arith.select %15, %129, %130 : vector<8x128xi1>, vector<8x128xf32>
    %132 = math.exp %131 : vector<8x128xf32>
    %cst_45 = arith.constant dense<0.000000e+00> : vector<8xf32>
    %133 = vector.multi_reduction <add>, %132, %cst_45 [1] : vector<8x128xf32> to vector<8xf32>
    %134 = vector.shape_cast %133 : vector<8xf32> to vector<8x1xf32>
    %135 = math.log %134 : vector<8x1xf32>
    %136 = vector.broadcast %135 : vector<8x1xf32> to vector<8x128xf32>
    %137 = arith.subf %129, %136 : vector<8x128xf32>
    %138 = arith.index_cast %c4_i32 : i32 to index
    %c0_46 = arith.constant 0 : index
    %c0_47 = arith.constant 0 : index
    %139 = vector.load %arg6[%138, %c0_46, %c0_47] : memref<8x8x128xf32, #tpu.memory_space<vmem>>, vector<1x8x128xf32>
    %140 = vector.shape_cast %139 : vector<1x8x128xf32> to vector<8x128xf32>
    %141 = vector.shape_cast %137 : vector<8x128xf32> to vector<1x8x128xf32>
    tpu.vector_store %arg6[%138, %c0_46, %c0_47], %141 {strides = array<i32>} : memref<8x8x128xf32, #tpu.memory_space<vmem>>, vector<1x8x128xf32>,
    %142 = vector.extract_strided_slice %123 {offsets = [0, 0], sizes = [8, 32], strides = [1, 1]} : vector<8x128xf32> to vector<8x32xf32>
    %c5_i32 = arith.constant 5 : i32
    %c8_i32_48 = arith.constant 8 : i32
    %143 = arith.muli %c5_i32, %c8_i32_48 : i32
    %144 = tpu.assume_multiple %143, 8 : i32
    %145 = arith.index_cast %144 : i32 to index
    %c0_49 = arith.constant 0 : index
    %146 = vector.load %arg9[%145, %c0_49] : memref<64x128xf32, #tpu.memory_space<vmem>>, vector<8x128xf32>
    %cst_50 = arith.constant dense<0.000000e+00> : vector<8x128xf32>
    %147 = tpu.matmul %142, %16, %cst_50 {dimension_numbers = #tpu.dot_dimension_numbers<[1], [0], [0], [1], [0, 0, 1, 1], [], []>} : vector<8x32xf32>, vector<32x128xf32>, vector<8x128xf32> -> vector<8x128xf32>
    %148 = arith.addf %146, %147 : vector<8x128xf32>
    %149 = vector.broadcast %cst_12 : f32 to vector<8x128xf32>
    %150 = arith.select %15, %148, %149 : vector<8x128xi1>, vector<8x128xf32>
    %cst_51 = arith.constant dense<0xFF800000> : vector<8xf32>
    %151 = vector.multi_reduction <maximumf>, %150, %cst_51 [1] : vector<8x128xf32> to vector<8xf32>
    %152 = vector.shape_cast %151 : vector<8xf32> to vector<8x1xf32>
    %153 = vector.broadcast %152 : vector<8x1xf32> to vector<8x128xf32>
    %154 = arith.subf %148, %153 : vector<8x128xf32>
    %155 = vector.broadcast %cst_12 : f32 to vector<8x128xf32>
    %156 = arith.select %15, %154, %155 : vector<8x128xi1>, vector<8x128xf32>
    %157 = math.exp %156 : vector<8x128xf32>
    %cst_52 = arith.constant dense<0.000000e+00> : vector<8xf32>
    %158 = vector.multi_reduction <add>, %157, %cst_52 [1] : vector<8x128xf32> to vector<8xf32>
    %159 = vector.shape_cast %158 : vector<8xf32> to vector<8x1xf32>
    %160 = math.log %159 : vector<8x1xf32>
    %161 = vector.broadcast %160 : vector<8x1xf32> to vector<8x128xf32>
    %162 = arith.subf %154, %161 : vector<8x128xf32>
    %163 = arith.index_cast %c5_i32 : i32 to index
    %c0_53 = arith.constant 0 : index
    %c0_54 = arith.constant 0 : index
    %164 = vector.load %arg6[%163, %c0_53, %c0_54] : memref<8x8x128xf32, #tpu.memory_space<vmem>>, vector<1x8x128xf32>
    %165 = vector.shape_cast %164 : vector<1x8x128xf32> to vector<8x128xf32>
    %166 = vector.shape_cast %162 : vector<8x128xf32> to vector<1x8x128xf32>
    tpu.vector_store %arg6[%163, %c0_53, %c0_54], %166 {strides = array<i32>} : memref<8x8x128xf32, #tpu.memory_space<vmem>>, vector<1x8x128xf32>,
    %167 = vector.extract_strided_slice %148 {offsets = [0, 0], sizes = [8, 32], strides = [1, 1]} : vector<8x128xf32> to vector<8x32xf32>
    %c6_i32 = arith.constant 6 : i32
    %c8_i32_55 = arith.constant 8 : i32
    %168 = arith.muli %c6_i32, %c8_i32_55 : i32
    %169 = tpu.assume_multiple %168, 8 : i32
    %170 = arith.index_cast %169 : i32 to index
    %c0_56 = arith.constant 0 : index
    %171 = vector.load %arg9[%170, %c0_56] : memref<64x128xf32, #tpu.memory_space<vmem>>, vector<8x128xf32>
    %cst_57 = arith.constant dense<0.000000e+00> : vector<8x128xf32>
    %172 = tpu.matmul %167, %16, %cst_57 {dimension_numbers = #tpu.dot_dimension_numbers<[1], [0], [0], [1], [0, 0, 1, 1], [], []>} : vector<8x32xf32>, vector<32x128xf32>, vector<8x128xf32> -> vector<8x128xf32>
    %173 = arith.addf %171, %172 : vector<8x128xf32>
    %174 = vector.broadcast %cst_12 : f32 to vector<8x128xf32>
    %175 = arith.select %15, %173, %174 : vector<8x128xi1>, vector<8x128xf32>
    %cst_58 = arith.constant dense<0xFF800000> : vector<8xf32>
    %176 = vector.multi_reduction <maximumf>, %175, %cst_58 [1] : vector<8x128xf32> to vector<8xf32>
    %177 = vector.shape_cast %176 : vector<8xf32> to vector<8x1xf32>
    %178 = vector.broadcast %177 : vector<8x1xf32> to vector<8x128xf32>
    %179 = arith.subf %173, %178 : vector<8x128xf32>
    %180 = vector.broadcast %cst_12 : f32 to vector<8x128xf32>
    %181 = arith.select %15, %179, %180 : vector<8x128xi1>, vector<8x128xf32>
    %182 = math.exp %181 : vector<8x128xf32>
    %cst_59 = arith.constant dense<0.000000e+00> : vector<8xf32>
    %183 = vector.multi_reduction <add>, %182, %cst_59 [1] : vector<8x128xf32> to vector<8xf32>
    %184 = vector.shape_cast %183 : vector<8xf32> to vector<8x1xf32>
    %185 = math.log %184 : vector<8x1xf32>
    %186 = vector.broadcast %185 : vector<8x1xf32> to vector<8x128xf32>
    %187 = arith.subf %179, %186 : vector<8x128xf32>
    %188 = arith.index_cast %c6_i32 : i32 to index
    %c0_60 = arith.constant 0 : index
    %c0_61 = arith.constant 0 : index
    %189 = vector.load %arg6[%188, %c0_60, %c0_61] : memref<8x8x128xf32, #tpu.memory_space<vmem>>, vector<1x8x128xf32>
    %190 = vector.shape_cast %189 : vector<1x8x128xf32> to vector<8x128xf32>
    %191 = vector.shape_cast %187 : vector<8x128xf32> to vector<1x8x128xf32>
    tpu.vector_store %arg6[%188, %c0_60, %c0_61], %191 {strides = array<i32>} : memref<8x8x128xf32, #tpu.memory_space<vmem>>, vector<1x8x128xf32>,
    %192 = vector.extract_strided_slice %173 {offsets = [0, 0], sizes = [8, 32], strides = [1, 1]} : vector<8x128xf32> to vector<8x32xf32>
    %c7_i32 = arith.constant 7 : i32
    %c8_i32_62 = arith.constant 8 : i32
    %193 = arith.muli %c7_i32, %c8_i32_62 : i32
    %194 = tpu.assume_multiple %193, 8 : i32
    %195 = arith.index_cast %194 : i32 to index
    %c0_63 = arith.constant 0 : index
    %196 = vector.load %arg9[%195, %c0_63] : memref<64x128xf32, #tpu.memory_space<vmem>>, vector<8x128xf32>
    %cst_64 = arith.constant dense<0.000000e+00> : vector<8x128xf32>
    %197 = tpu.matmul %192, %16, %cst_64 {dimension_numbers = #tpu.dot_dimension_numbers<[1], [0], [0], [1], [0, 0, 1, 1], [], []>} : vector<8x32xf32>, vector<32x128xf32>, vector<8x128xf32> -> vector<8x128xf32>
    %198 = arith.addf %196, %197 : vector<8x128xf32>
    %199 = vector.broadcast %cst_12 : f32 to vector<8x128xf32>
    %200 = arith.select %15, %198, %199 : vector<8x128xi1>, vector<8x128xf32>
    %cst_65 = arith.constant dense<0xFF800000> : vector<8xf32>
    %201 = vector.multi_reduction <maximumf>, %200, %cst_65 [1] : vector<8x128xf32> to vector<8xf32>
    %202 = vector.shape_cast %201 : vector<8xf32> to vector<8x1xf32>
    %203 = vector.broadcast %202 : vector<8x1xf32> to vector<8x128xf32>
    %204 = arith.subf %198, %203 : vector<8x128xf32>
    %205 = vector.broadcast %cst_12 : f32 to vector<8x128xf32>
    %206 = arith.select %15, %204, %205 : vector<8x128xi1>, vector<8x128xf32>
    %207 = math.exp %206 : vector<8x128xf32>
    %cst_66 = arith.constant dense<0.000000e+00> : vector<8xf32>
    %208 = vector.multi_reduction <add>, %207, %cst_66 [1] : vector<8x128xf32> to vector<8xf32>
    %209 = vector.shape_cast %208 : vector<8xf32> to vector<8x1xf32>
    %210 = math.log %209 : vector<8x1xf32>
    %211 = vector.broadcast %210 : vector<8x1xf32> to vector<8x128xf32>
    %212 = arith.subf %204, %211 : vector<8x128xf32>
    %213 = arith.index_cast %c7_i32 : i32 to index
    %c0_67 = arith.constant 0 : index
    %c0_68 = arith.constant 0 : index
    %214 = vector.load %arg6[%213, %c0_67, %c0_68] : memref<8x8x128xf32, #tpu.memory_space<vmem>>, vector<1x8x128xf32>
    %215 = vector.shape_cast %214 : vector<1x8x128xf32> to vector<8x128xf32>
    %216 = vector.shape_cast %212 : vector<8x128xf32> to vector<1x8x128xf32>
    tpu.vector_store %arg6[%213, %c0_67, %c0_68], %216 {strides = array<i32>} : memref<8x8x128xf32, #tpu.memory_space<vmem>>, vector<1x8x128xf32>,
    %217 = vector.extract_strided_slice %198 {offsets = [0, 0], sizes = [8, 32], strides = [1, 1]} : vector<8x128xf32> to vector<8x32xf32>
    %c8_i32_69 = arith.constant 8 : i32
    %c0_70 = arith.constant 0 : index
    %c0_71 = arith.constant 0 : index
    %218 = vector.load %arg8[%c0_70, %c0_71] : memref<8x32xf32, #tpu.memory_space<vmem>>, vector<8x32xf32>
    tpu.vector_store %arg8[%c0_70, %c0_71], %217 {strides = array<i32>} : memref<8x32xf32, #tpu.memory_space<vmem>>, vector<8x32xf32>,
    %c0_i32_72 = arith.constant 0 : i32
    %219 = arith.cmpi eq, %arg0, %c0_i32_72 : i32
    %220 = arith.extui %219 : i1 to i32
    %c0_i32_73 = arith.constant 0 : i32
    %221 = arith.cmpi ne, %220, %c0_i32_73 : i32
    scf.if %221 {
      %c0_74 = arith.constant 0 : index
      %c0_75 = arith.constant 0 : index
      %222 = vector.load %arg7[%c0_74, %c0_75] : memref<8x32xf32, #tpu.memory_space<vmem>>, vector<8x32xf32>
      tpu.vector_store %arg7[%c0_74, %c0_75], %217 {strides = array<i32>} : memref<8x32xf32, #tpu.memory_space<vmem>>, vector<8x32xf32>,
    } else {
    }
    return
  }
  func.func @transform_0(%arg0: i32) -> (i32, i32) {
    %c0_i32 = arith.constant 0 : i32
    %c0_i32_0 = arith.constant 0 : i32
    return %arg0, %c0_i32 : i32, i32
  }
  func.func @transform_1(%arg0: i32) -> (i32, i32) {
    %c0_i32 = arith.constant 0 : i32
    %c0_i32_0 = arith.constant 0 : i32
    %c0_i32_1 = arith.constant 0 : i32
    return %c0_i32, %c0_i32_0 : i32, i32
  }
  func.func @transform_2(%arg0: i32) -> (i32, i32) {
    %c0_i32 = arith.constant 0 : i32
    %c0_i32_0 = arith.constant 0 : i32
    %c0_i32_1 = arith.constant 0 : i32
    return %c0_i32, %c0_i32_0 : i32, i32
  }
  func.func @transform_3(%arg0: i32) -> (i32, i32) {
    %c0_i32 = arith.constant 0 : i32
    %c0_i32_0 = arith.constant 0 : i32
    %c0_i32_1 = arith.constant 0 : i32
    return %c0_i32, %c0_i32_0 : i32, i32
  }
  func.func @transform_4(%arg0: i32) -> (i32, i32) {
    %c0_i32 = arith.constant 0 : i32
    %c0_i32_0 = arith.constant 0 : i32
    %c0_i32_1 = arith.constant 0 : i32
    return %c0_i32, %c0_i32_0 : i32, i32
  }
  func.func @transform_5(%arg0: i32) -> (i32, i32, i32) {
    %c0_i32 = arith.constant 0 : i32
    %c0_i32_0 = arith.constant 0 : i32
    %c0_i32_1 = arith.constant 0 : i32
    return %arg0, %c0_i32, %c0_i32_0 : i32, i32, i32
  }
  func.func @transform_6(%arg0: i32) -> (i32, i32) {
    %c0_i32 = arith.constant 0 : i32
    %c0_i32_0 = arith.constant 0 : i32
    %c0_i32_1 = arith.constant 0 : i32
    return %c0_i32, %c0_i32_0 : i32, i32
  }
}

</mosaic_0001>

<bundles_post_ra>
// kernel: tpu_custom_call.1
= control target key start
LH: loop header
LB: loop body
LE: loop exit
PB: predicated region body
PF: predicated region fallthrough
CT: control target
= control target key end

     0   :  { %12 = vsyncpa [#allocation5], 0  ;;  %s808_s0 = inlined_call_operand.vmem [shape: f32[64,16], index: 0, kind: input, shape index: {}]   ;;  %s809_s1 = inlined_call_operand.hbm [shape: f32[8,32], index: 1, kind: input, shape index: {}, may-alias: {1,6}]   ;;  %s810_s2 = inlined_call_operand.vmem [shape: f32[16,128], index: 2, kind: input, shape index: {}]   ;;  %s811_s3 = inlined_call_operand.vmem [shape: f32[32,128], index: 3, kind: input, shape index: {}]   ;;  %s812_s4 = inlined_call_operand.vmem [shape: f32[1,128], index: 4, kind: input, shape index: {}]   ;;  %s813_s5 = inlined_call_operand.hbm [shape: f32[8,8,128], index: 5, kind: output, shape index: {0}]   ;;  %s814_s6 = inlined_call_operand.hbm [shape: f32[8,32], index: 6, kind: output, shape index: {1}, may-alias: {1,6}]  }
   0x1   :  { %13 = vsyncpa [#allocation6], 0 }
   0x2   :  { %14 = vsyncpa [#allocation9], 0  ;;  %s22_s23 = sshll.u32 %s809_s1, 4  ;;  %s636_s24 = smov [#allocation4]   ;;  %s23_s23 = int_to_ptr.hbm [resolvable:$true] %s22_s23 }
   0x3   :  { %s24_s25 = sshll.u32 %s636_s24, 4  ;;  %s25_s25 = int_to_ptr.vmem [resolvable:$true] %s24_s25 }
   0x4   :  { %27 = dma.hbm_to_vmem [thread:$0]  %s23_s23, 128, %s25_s25, [#allocation5]  }
   0x5   :  { %630 = dma.done.wait [#allocation5], 128  }
   0x6   :  { %631 = vsyncadd [#allocation5], 4294967168  ;;  %v141_v0 = vld [vmem:[%s811_s3 + $0x18] sm:$0xff]  ;;  %v54_v1 = vld [vmem:[%s810_s2 + $0x8] sm:$0xff]  ;;  %vm43_vm0 = vcmask 261120   ;;  %vm59_vm1 = vcmask 130048   ;;  %v133_v11 = vlaneseq }
   0x7   :  { %v140_v2 = vld [vmem:[%s811_s3 + $0x10] sm:$0xff]  ;;  %160 = vmatpush.msra.mxu1 %v141_v0  ;;  %98 = vmatpush.msra.mxu0 %v54_v1  ;;  %v53_v3 = vld [vmem:[%s810_s2] sm:$0xff]  ;;  %v139_v5 = vld [vmem:[%s811_s3 + $0x8] sm:$0xff]  ;;  %s487_s7 = sshll.u32 %s814_s6, 4  ;;  %s638_s1 = smov [#allocation7]   ;;  %s488_s7 = int_to_ptr.hbm [resolvable:$true] %s487_s7 }
   0x8   :  { %v45_v4 = vld [vmem:[%s808_s0] sm:$0xff]  ;;  %v42_v6 = vld [vmem:[#allocation4] sm:$0xff]  ;;  %199 = vmatpush.msra.mxu2 %v141_v0  ;;  %518 = vmatpush.msra.mxu3 %v54_v1  ;;  %v134_v13 = vand.u32 127, %v133_v11  ;;  %v51_v20 = vld [vmem:[%s808_s0 + $0x30] sm:$0xff]  ;;  %s471_s8 = sshll.u32 %s638_s1, 4  ;;  %s473_s6 = sshll.u32 %s813_s5, 4  ;;  %s472_s8 = int_to_ptr.vmem [resolvable:$true] %s471_s8  ;;  %s474_s6 = int_to_ptr.hbm [resolvable:$true] %s473_s6 }
   0x9   :  { %161 = vmatpush.msra.mxu1 %v140_v2  ;;  %99 = vmatpush.msra.mxu0 %v53_v3  ;;  %44 = vst.msk [vmem:[#allocation2] sm:$0xff] %vm43_vm0, %v42_v6  ;;  %v138_v7 = vld [vmem:[%s811_s3] sm:$0xff]  ;;  %v46_v9 = vld [vmem:[%s808_s0 + $0x8] sm:$0xff]  ;;  %v52_v21 = vld [vmem:[%s808_s0 + $0x38] sm:$0xff]  ;;  %s639_s11 = smov 128   ;;  %s640_s12 = smov 8  }
   0xa   :  { %502 = vmatmul.msk.f32.vlgmr.msra.gmra.mxu0 %vm59_vm1, %v45_v4  ;;  %200 = vmatpush.msra.mxu2 %v140_v2  ;;  %v50_v10 = vld [vmem:[%s808_s0 + $0x28] sm:$0xff]  ;;  %v714_v12 = vld [vmem:[%s812_s4] ss:$0 sm:$0xff]  ;;  %vm135_vm2 = vcmp.ge.s32.totalorder %v134_v13, 32  ;;  %vm136_vm3 = vcmp.lt.s32.totalorder %v134_v13, 40  ;;  %v47_v22 = vld [vmem:[%s808_s0 + $0x10] sm:$0xff] }
   0xb   :  { %162 = vmatpush.msra.mxu1 %v139_v5  ;;  %519 = vmatpush.msra.mxu3 %v53_v3  ;;  %vm717_vm4 = vmand %vm135_vm2, %vm136_vm3  ;;  %v48_v28 = vld [vmem:[%s808_s0 + $0x18] sm:$0xff]  ;;  %v49_v37 = vld [vmem:[%s808_s0 + $0x20] sm:$0xff]  ;;  %s637_s0 = smov [#allocation8]  }
   0xc   :  { %201 = vmatpush.msra.mxu2 %v139_v5  ;;  %507 = vmatmul.msk.f32.vlgmr.msra.gmra.mxu3 %vm59_vm1, %v50_v10  ;;  %s485_s28 = sshll.u32 %s637_s0, 4  ;;  %s486_s28 = int_to_ptr.vmem [resolvable:$true] %s485_s28 }
   0xd   :  { %239 = vmatpush.msrb.mxu3 %v141_v0  ;;  %163 = vmatpush.msra.mxu1 %v138_v7 }
   0xe   :  { %202 = vmatpush.msra.mxu2 %v138_v7 }
   0xf   :  { %240 = vmatpush.msrb.mxu3 %v140_v2  ;;  %279 = vmatpush.msrb.mxu1 %v141_v0 }
  0x10   :  { %319 = vmatpush.msrb.mxu2 %v141_v0  ;;  %v142_v8 = vld [vmem:[#allocation2] sm:$0xff] }
  0x11   :  { %241 = vmatpush.msrb.mxu3 %v139_v5  ;;  %510 = vmatmul.msk.f32.vlgmr.msra.gmra.mxu1 %vm43_vm0, %v142_v8 }
  0x12   :  { %320 = vmatpush.msrb.mxu2 %v140_v2  ;;  %280 = vmatpush.msrb.mxu1 %v140_v2 }
  0x13   :  { %242 = vmatpush.msrb.mxu3 %v138_v7  ;;  %503 = vmatmul.msk.f32.gmra.mxu0 %vm59_vm1, %v46_v9 }
  0x14   :  { %321 = vmatpush.msrb.mxu2 %v139_v5  ;;  %281 = vmatpush.msrb.mxu1 %v139_v5 }
  0x15   :  { %359 = vmatpush.msra.mxu3 %v141_v0 }
  0x16   :  { %322 = vmatpush.msrb.mxu2 %v138_v7  ;;  %282 = vmatpush.msrb.mxu1 %v138_v7 }
  0x17   :  { %360 = vmatpush.msra.mxu3 %v140_v2 }
  0x18   :  { %399 = vmatpush.msra.mxu1 %v141_v0  ;;  %508 = vmatmul.msk.f32.gmra.mxu3 %vm59_vm1, %v51_v20 }
  0x19   :  { %361 = vmatpush.msra.mxu3 %v139_v5 }
  0x1a   :  { %400 = vmatpush.msra.mxu1 %v140_v2 }
  0x1b   :  { %362 = vmatpush.msra.mxu3 %v138_v7  ;;  %504 = vmatmul.msk.f32.gmra.mxu0 %vm59_vm1, %v47_v22 }
  0x1c   :  { %401 = vmatpush.msra.mxu1 %v139_v5 }
  0x1e   :  { %402 = vmatpush.msra.mxu1 %v138_v7 }
  0x20   :  { %509 = vmatmul.msk.f32.gmra.mxu3 %vm59_vm1, %v52_v21 }
  0x23   :  { %505 = vmatmul.msk.f32.gmra.mxu0 %vm59_vm1, %v48_v28 }
  0x2b   :  { %506 = vmatmul.msk.f32.gmra.mxu0 %vm59_vm1, %v49_v37 }
  0x87   :  { %v101_v14 = vpop.f32.mrf.mxu0 }
  0x88   :  { %v102_v15 = vadd.f32 %v714_v12, %v101_v14 }
  0x8e   :  { %v165_v16 = vpop.f32.mrf.mxu1 }
  0x8f   :  { %v168_v18 = vadd.f32 %v165_v16, %v102_v15  ;;  %v116_v29 = vpop.f32.mrf.mxu3 }
  0x90   :  { %v104_v23 = vpop.f32.mrf.mxu0  ;;  %v117_v52 = vadd.f32 %v714_v12, %v116_v29 }
  0x91   :  { %511 = vmatmul.msk.f32.vlgmr.msra.gmra.mxu2 %vm43_vm0, %v168_v18  ;;  %v169_v19 = vsel %vm717_vm4, %v168_v18, -1e+30  ;;  %v105_v24 = vadd.f32 %v714_v12, %v104_v23 }
  0x92   :  { %170 = vmax.xlane.f32.xlu0 %v169_v19  ;;  %439 = vmatpush.msra.mxu2 %v141_v0 }
  0x94   :  { %440 = vmatpush.msra.mxu2 %v140_v2 }
  0x96   :  { %441 = vmatpush.msra.mxu2 %v139_v5 }
  0x98   :  { %442 = vmatpush.msra.mxu2 %v138_v7  ;;  %v107_v32 = vpop.f32.mrf.mxu0 }
  0x99   :  { %v108_v33 = vadd.f32 %v714_v12, %v107_v32 }
  0x9b   :  { %v119_v30 = vpop.f32.mrf.mxu3 }
  0x9c   :  { %v120_v4 = vadd.f32 %v714_v12, %v119_v30 }
  0xa0   :  { %v110_v38 = vpop.f32.mrf.mxu0 }
  0xa1   :  { %v111_v39 = vadd.f32 %v714_v12, %v110_v38 }
  0xa3   :  { %v744_v31 = vpop.f32.mrf.mxu3 }
  0xa8   :  { %v113_v43 = vpop.f32.mrf.mxu0 }
  0xa9   :  { %v114_v44 = vadd.f32 %v714_v12, %v113_v43 }
 0x105   :  { %v171_v48 = vpop.xlane.xlu0 %170 }
 0x106   :  { %v172_v50 = vsub.f32 %v168_v18, %v171_v48 }
 0x108   :  { %v173_v51 = vsel %vm717_vm4, %v172_v50, -1e+30 }
 0x109   :  { %v174_v55 = vmul.f32 1.442695, %v173_v51 }
 0x10b   :  { %526 = vpow2.f32 %v174_v55 }
 0x111   :  { %v527_v61 = vpop.eup %526 }
 0x114   :  { %v204_v25 = vpop.f32.mrf.mxu2 }
 0x115   :  { %v207_v26 = vadd.f32 %v204_v25, %v105_v24 }
 0x117   :  { %512 = vmatmul.msk.f32.vlgmr.msrb.gmra.mxu3 %vm43_vm0, %v207_v26  ;;  %v208_v27 = vsel %vm717_vm4, %v207_v26, -1e+30 }
 0x118   :  { %209 = vmax.xlane.f32.xlu0 %v208_v27 }
 0x18b   :  { %v210_v0 = vpop.xlane.xlu0 %209 }
 0x18c   :  { %v211_v2 = vsub.f32 %v207_v26, %v210_v0 }
 0x18e   :  { %v212_v3 = vsel %vm717_vm4, %v211_v2, -1e+30 }
 0x18f   :  { %v213_v7 = vmul.f32 1.442695, %v212_v3 }
 0x19a   :  { %v244_v34 = vpop.f32.mrf.mxu3 }
 0x19b   :  { %v747_v35 = vadd.f32 %v244_v34, %v108_v33  ;;  %v123_v33 = vadd.f32 %v714_v12, %v744_v31 }
 0x19d   :  { %513 = vmatmul.msk.f32.vlgmr.msrb.gmra.mxu1 %vm43_vm0, %v747_v35  ;;  %v248_v36 = vsel %vm717_vm4, %v747_v35, -1e+30 }
 0x19e   :  { %249 = vmax.xlane.f32.xlu1 %v248_v36 }
 0x211   :  { %v250_v49 = vpop.xlane.xlu1 %249 }
 0x212   :  { %v251_v29 = vsub.f32 %v747_v35, %v250_v49 }
 0x214   :  { %v252_v32 = vsel %vm717_vm4, %v251_v29, -1e+30 }
 0x215   :  { %v253_v37 = vmul.f32 1.442695, %v252_v32 }
 0x21a   :  { %v284_v40 = vpop.f32.mrf.mxu1 }
 0x21b   :  { %v287_v41 = vadd.f32 %v284_v40, %v111_v39 }
 0x21d   :  { %514 = vmatmul.msk.f32.vlgmr.msrb.gmra.mxu2 %vm43_vm0, %v287_v41  ;;  %v288_v42 = vsel %vm717_vm4, %v287_v41, -1e+30 }
 0x21e   :  { %289 = vmax.xlane.f32.xlu1 %v288_v42 }
 0x291   :  { %v290_v53 = vpop.xlane.xlu1 %289 }
 0x292   :  { %v291_v57 = vsub.f32 %v287_v41, %v290_v53 }
 0x294   :  { %v292_v59 = vsel %vm717_vm4, %v291_v57, -1e+30 }
 0x295   :  { %v293_v60 = vmul.f32 1.442695, %v292_v59 }
 0x297   :  { %528 = vpow2.f32 %v293_v60 }
 0x29d   :  { %v529_v62 = vpop.eup %528 }
 0x2a0   :  { %v324_v45 = vpop.f32.mrf.mxu2 }
 0x2a1   :  { %v327_v46 = vadd.f32 %v324_v45, %v114_v44 }
 0x2a3   :  { %515 = vmatmul.msk.f32.vlgmr.msra.gmra.mxu3 %vm43_vm0, %v327_v46  ;;  %v328_v47 = vsel %vm717_vm4, %v327_v46, -1e+30 }
 0x2a4   :  { %329 = vmax.xlane.f32.xlu2 %v328_v47 }
 0x317   :  { %v330_v63 = vpop.xlane.xlu2 %329 }
 0x318   :  { %v331_v9 = vsub.f32 %v327_v46, %v330_v63 }
 0x31a   :  { %v332_v13 = vsel %vm717_vm4, %v331_v9, -1e+30 }
 0x31b   :  { %v333_v16 = vmul.f32 1.442695, %v332_v13 }
 0x326   :  { %v364_v54 = vpop.f32.mrf.mxu3 }
 0x327   :  { %v769_v56 = vadd.f32 %v364_v54, %v117_v52 }
 0x329   :  { %516 = vmatmul.msk.f32.vlgmr.msra.gmra.mxu1 %vm43_vm0, %v769_v56  ;;  %v368_v58 = vsel %vm717_vm4, %v769_v56, -1e+30 }
 0x32a   :  { %369 = vmax.xlane.f32.xlu2 %v368_v58 }
 0x332   :  { %176 = vadd.xlane.f32.xlu2 %v527_v61 }
 0x33a   :  { %295 = vadd.xlane.f32.xlu2 %v529_v62 }
 0x39d   :  { %v370_v1 = vpop.xlane.xlu2 %369 }
 0x39e   :  { %v371_v41 = vsub.f32 %v769_v56, %v370_v1 }
 0x3a0   :  { %v372_v12 = vsel %vm717_vm4, %v371_v41, -1e+30 }
 0x3a1   :  { %v373_v43 = vmul.f32 1.442695, %v372_v12 }
 0x3a5   :  { %v177_v5 = vpop.xlane.xlu2 %176 }
 0x3a6   :  { %530 = vlog2.f32 %v177_v5  ;;  %v404_v6 = vpop.f32.mrf.mxu1 }
 0x3a7   :  { %v407_v8 = vadd.f32 %v404_v6, %v120_v4  ;;  %532 = vpow2.f32 %v213_v7 }
 0x3a9   :  { %517 = vmatmul.msk.f32.vlgmr.msra.gmra.mxu2 %vm43_vm0, %v407_v8  ;;  %v408_v10 = vsel %vm717_vm4, %v407_v8, -1e+30 }
 0x3aa   :  { %409 = vmax.xlane.f32.xlu0 %v408_v10 }
 0x3ac   :  { %v531_v11 = vpop.eup %530 }
 0x3ad   :  { %v179_v14 = vmul.f32 0.6931472, %v531_v11  ;;  %v296_v15 = vpop.xlane.xlu2 %295  ;;  %v533_v19 = vpop.eup %532 }
 0x3ae   :  { %534 = vlog2.f32 %v296_v15 }
 0x3af   :  { %v180_v18 = vsub.f32 %v172_v50, %v179_v14  ;;  %536 = vpow2.f32 %v333_v16 }
 0x3b1   :  { %181 = vst [vmem:[#allocation7] sm:$0xff] %v180_v18 }
 0x3b2   :  { %215 = vadd.xlane.f32.xlu0 %v533_v19 }
 0x3b4   :  { %v535_v20 = vpop.eup %534 }
 0x3b5   :  { %v298_v21 = vmul.f32 0.6931472, %v535_v20  ;;  %v537_v23 = vpop.eup %536 }
 0x3b7   :  { %v299_v22 = vsub.f32 %v291_v57, %v298_v21 }
 0x3b9   :  { %301 = vst [vmem:[#allocation7 + $0x18] sm:$0xff] %v299_v22 }
 0x3ba   :  { %335 = vadd.xlane.f32.xlu0 %v537_v23 }
 0x41d   :  { %v410_v24 = vpop.xlane.xlu0 %409 }
 0x41e   :  { %v411_v25 = vsub.f32 %v407_v8, %v410_v24 }
 0x420   :  { %v412_v26 = vsel %vm717_vm4, %v411_v25, -1e+30 }
 0x421   :  { %v413_v27 = vmul.f32 1.442695, %v412_v26 }
 0x423   :  { %538 = vpow2.f32 %v413_v27 }
 0x425   :  { %v216_v28 = vpop.xlane.xlu0 %215 }
 0x426   :  { %540 = vlog2.f32 %v216_v28 }
 0x429   :  { %v539_v30 = vpop.eup %538 }
 0x42a   :  { %415 = vadd.xlane.f32.xlu2 %v539_v30 }
 0x42c   :  { %v541_v34 = vpop.eup %540  ;;  %v444_v36 = vpop.f32.mrf.mxu2 }
 0x42d   :  { %v218_v38 = vmul.f32 0.6931472, %v541_v34  ;;  %v447_v39 = vadd.f32 %v444_v36, %v123_v33  ;;  %v336_v40 = vpop.xlane.xlu0 %335 }
 0x42e   :  { %542 = vlog2.f32 %v336_v40 }
 0x42f   :  { %v219_v42 = vsub.f32 %v211_v2, %v218_v38  ;;  %462 = vst.msk [vmem:[#allocation2] sm:$0xff] %vm43_vm0, %v447_v39  ;;  %v448_v35 = vsel %vm717_vm4, %v447_v39, -1e+30  ;;  %544 = vpow2.f32 %v253_v37 }
 0x430   :  { %466 = vst.msk [vmem:[#allocation8] sm:$0xff] %vm43_vm0, %v447_v39  ;;  %449 = vmax.xlane.f32.xlu1 %v448_v35  ;;  %546 = vpow2.f32 %v373_v43 }
 0x431   :  { %221 = vst [vmem:[#allocation7 + $0x8] sm:$0xff] %v219_v42  ;;  %490 = dma.vmem_to_hbm [thread:$0]  %s486_s28, 128, %s488_s7, [#allocation9]  }
 0x434   :  { %v543_v31 = vpop.eup %542 }
 0x435   :  { %v338_v44 = vmul.f32 0.6931472, %v543_v31  ;;  %v545_v45 = vpop.eup %544 }
 0x436   :  { %v547_v47 = vpop.eup %546 }
 0x437   :  { %v339_v46 = vsub.f32 %v331_v9, %v338_v44 }
 0x438   :  { %255 = vadd.xlane.f32.xlu1 %v545_v45 }
 0x439   :  { %341 = vst [vmem:[#allocation7 + $0x20] sm:$0xff] %v339_v46 }
 0x440   :  { %375 = vadd.xlane.f32.xlu1 %v547_v47 }
 0x49d   :  { %v416_v48 = vpop.xlane.xlu2 %415 }
 0x49e   :  { %548 = vlog2.f32 %v416_v48 }
 0x4a3   :  { %v450_v49 = vpop.xlane.xlu1 %449 }
 0x4a4   :  { %v549_v50 = vpop.eup %548  ;;  %v451_v51 = vsub.f32 %v447_v39, %v450_v49 }
 0x4a5   :  { %v418_v52 = vmul.f32 0.6931472, %v549_v50 }
 0x4a6   :  { %v452_v53 = vsel %vm717_vm4, %v451_v51, -1e+30 }
 0x4a7   :  { %v419_v54 = vsub.f32 %v411_v25, %v418_v52  ;;  %v453_v55 = vmul.f32 1.442695, %v452_v53 }
 0x4a9   :  { %421 = vst [vmem:[#allocation7 + $0x30] sm:$0xff] %v419_v54  ;;  %550 = vpow2.f32 %v453_v55 }
 0x4ab   :  { %v256_v56 = vpop.xlane.xlu1 %255 }
 0x4ac   :  { %552 = vlog2.f32 %v256_v56 }
 0x4af   :  { %v551_v57 = vpop.eup %550 }
 0x4b0   :  { %455 = vadd.xlane.f32.xlu0 %v551_v57 }
 0x4b2   :  { %v553_v58 = vpop.eup %552 }
 0x4b3   :  { %v258_v59 = vmul.f32 0.6931472, %v553_v58  ;;  %v376_v60 = vpop.xlane.xlu1 %375 }
 0x4b4   :  { %554 = vlog2.f32 %v376_v60 }
 0x4b5   :  { %v259_v17 = vsub.f32 %v251_v29, %v258_v59 }
 0x4b7   :  { %261 = vst [vmem:[#allocation7 + $0x10] sm:$0xff] %v259_v17 }
 0x4ba   :  { %v555_v61 = vpop.eup %554 }
 0x4bb   :  { %v378_v62 = vmul.f32 0.6931472, %v555_v61 }
 0x4bd   :  { %v379_v63 = vsub.f32 %v371_v41, %v378_v62 }
 0x4bf   :  { %381 = vst [vmem:[#allocation7 + $0x28] sm:$0xff] %v379_v63 }
 0x523   :  { %v456_v0 = vpop.xlane.xlu0 %455 }
 0x524   :  { %556 = vlog2.f32 %v456_v0 }
 0x52a   :  { %v557_v1 = vpop.eup %556 }
 0x52b   :  { %v458_v2 = vmul.f32 0.6931472, %v557_v1 }
 0x52d   :  { %v459_v3 = vsub.f32 %v451_v51, %v458_v2 }
 0x52f   :  { %461 = vst [vmem:[#allocation7 + $0x38] sm:$0xff] %v459_v3 }
 0x530   :  { %479 = dma.vmem_to_hbm [thread:$0]  %s472_s8, 1024, %s474_s6, [#allocation6], %s639_s11, %s639_s11, %s640_s12  }
 0x531   :  { %632 = dma.done.wait [#allocation6], 1024  }
 0x532   :  { %633 = vsyncadd [#allocation6], 4294966272 }
 0x533   :  { %634 = dma.done.wait [#allocation9], 128  }
 0x534   :  { %635 = vsyncadd [#allocation9], 4294967168 }
 0x535   :  { %499 = vsyncpa [#allocation5], 1 }
 0x536   :  { %500 = vsyncpa [#allocation6], 1 }
 0x537   :  { %501 = vsyncpa [#allocation9], 1 }

</bundles_post_ra>
